<compile_context>
chip_gen: v7x
topology: tpu7x:2x2x1
jax: 0.10.0
libtpu: 0.0.40
codegen_flags: <defaults>
</compile_context>

<pallas_src>
import functools
import inspect
import math

import jax
import jax.numpy as jnp
from jax.experimental import pallas as pl
from jax.experimental.pallas import tpu as pltpu

_LANE = 128
_SUBLANE = 8


def _round_up(x: int, m: int) -> int:
    return (x + m - 1) // m * m


def _pad_axis(a, axis, target):
    pad = target - a.shape[axis]
    if pad <= 0:
        return a
    widths = [(0, 0)] * a.ndim
    widths[axis] = (0, pad)
    return jnp.pad(a, widths)


def _supports_pipeline_mode() -> bool:
    """One-time feature check for BlockSpec(pipeline_mode=pl.Buffered(1))."""
    if not hasattr(pl, "Buffered"):
        return False
    try:
        return "pipeline_mode" in inspect.signature(pl.BlockSpec).parameters
    except (TypeError, ValueError):
        return False


_HAS_PIPELINE_MODE = _supports_pipeline_mode()


def _pick_n_tile(dout_p: int, block_n: int) -> int:
    """Largest multiple-of-128 divisor of dout_p that is <= block_n."""
    lanes = dout_p // _LANE
    best = 1
    for m in range(1, max(block_n // _LANE, 1) + 1):
        if lanes % m == 0:
            best = m
    return best * _LANE


# --------------------------------------------------------------------------
# Kernels (all compute — matmuls, bias add, SiLU — lives here)
# --------------------------------------------------------------------------
def _mlp_kernel(x_ref, w1_ref, b1_ref, w2_ref, b2_ref, out_ref, h_ref, *,
                post_act):
    # j == 0: compute the shared intermediate h = SiLU(x @ W1 + b1) once per
    # batch block into VMEM scratch; reused for every W2 column tile.
    @pl.when(pl.program_id(1) == 0)
    def _():
        x = x_ref[...].astype(w1_ref.dtype)
        h = jnp.dot(x, w1_ref[...], preferred_element_type=jnp.float32)
        h = h + b1_ref[...].astype(jnp.float32)
        h_ref[...] = h * jax.nn.sigmoid(h)

    # linear_2 on the current Dout tile of W2 (streamed when grid[1] > 1).
    y = jnp.dot(h_ref[...].astype(w2_ref.dtype), w2_ref[...],
                preferred_element_type=jnp.float32)
    y = y + b2_ref[...].astype(jnp.float32)
    if post_act:
        y = y * jax.nn.sigmoid(y)
    out_ref[...] = y.astype(out_ref.dtype)


def _mlp_cond_kernel(x_ref, c_ref, wc_ref, w1_ref, b1_ref, w2_ref, b2_ref,
                     out_ref, h_ref, *, post_act):
    @pl.when(pl.program_id(1) == 0)
    def _():
        # cond_proj: condition @ Wc (no bias), added to sample in f32.
        cadd = jnp.dot(c_ref[...].astype(wc_ref.dtype), wc_ref[...],
                       preferred_element_type=jnp.float32)
        x = x_ref[...].astype(jnp.float32) + cadd
        h = jnp.dot(x.astype(w1_ref.dtype), w1_ref[...],
                    preferred_element_type=jnp.float32)
        h = h + b1_ref[...].astype(jnp.float32)
        h_ref[...] = h * jax.nn.sigmoid(h)

    y = jnp.dot(h_ref[...].astype(w2_ref.dtype), w2_ref[...],
                preferred_element_type=jnp.float32)
    y = y + b2_ref[...].astype(jnp.float32)
    if post_act:
        y = y * jax.nn.sigmoid(y)
    out_ref[...] = y.astype(out_ref.dtype)


# --------------------------------------------------------------------------
# One-time parameter preparation (pad to lane multiples, optional bf16 cast)
# --------------------------------------------------------------------------
def prepare_params(params, weights_dtype=None):
    """Pad weights/biases to multiples of 128 lanes ONCE at load time.

    params (pre-transposed kernel layout):
      w1 [in_channels, time_embed_dim], b1 [1, time_embed_dim]
      w2 [time_embed_dim, out_dim],     b2 [1, out_dim]
      wc [cond_proj_dim, in_channels]   (optional)
    weights_dtype: e.g. jnp.bfloat16 to halve weight DMA (f32 accumulation is
      kept inside the kernel).
    """
    w1, b1, w2, b2 = params["w1"], params["b1"], params["w2"], params["b2"]
    Cin, D = w1.shape
    Dout = w2.shape[1]
    Cin_p, D_p, Dout_p = (_round_up(Cin, _LANE), _round_up(D, _LANE),
                          _round_up(Dout, _LANE))

    def cvt(a):
        return a.astype(weights_dtype) if weights_dtype is not None else a

    prepared = {
        "w1": cvt(_pad_axis(_pad_axis(w1, 0, Cin_p), 1, D_p)),
        "b1": cvt(_pad_axis(b1, 1, D_p)),
        "w2": cvt(_pad_axis(_pad_axis(w2, 0, D_p), 1, Dout_p)),
        "b2": cvt(_pad_axis(b2, 1, Dout_p)),
        "dims": (Cin, D, Dout, None),
    }
    if "wc" in params:
        wc = params["wc"]
        Ccond = wc.shape[0]
        Ccond_p = _round_up(Ccond, _LANE)
        prepared["wc"] = cvt(_pad_axis(_pad_axis(wc, 0, Ccond_p), 1, Cin_p))
        prepared["dims"] = (Cin, D, Dout, Ccond)
    return prepared


# --------------------------------------------------------------------------
# Wrapper
# --------------------------------------------------------------------------
def timestep_embedding_forward(sample, prepared, condition=None, *,
                               post_act=False, block_b=256, block_n=512):
    """Fused TimestepEmbedding forward.

    sample:    [B, in_channels]
    condition: [B, cond_proj_dim] or None
    prepared:  output of prepare_params() (padded/cast weights).
    block_b:   batch tile (multiple of 8).  256 works on v5e/v6e/v7x; only
               shrink it if the scoped VMEM limit actually binds.
    block_n:   max Dout tile width (multiple of 128) used when W2 is streamed.
    """
    assert block_b % _SUBLANE == 0 and block_n % _LANE == 0
    Cin, D, Dout, Ccond = prepared["dims"]
    w1, b1, w2, b2 = prepared["w1"], prepared["b1"], prepared["w2"], prepared["b2"]
    Cin_p, D_p = w1.shape
    Dout_p = w2.shape[1]

    B = sample.shape[0]
    assert sample.shape[1] == Cin

    has_cond = condition is not None
    if has_cond:
        assert "wc" in prepared, "condition given but params have no cond_proj"
        wc = prepared["wc"]
        Ccond_p = wc.shape[0]
        assert condition.shape == (B, Ccond)
    else:
        Ccond_p = 0

    # ---- Batch padding / tiling (no OOB last block; full unmasked stores) --
    B8 = _round_up(max(B, 1), _SUBLANE)
    if B8 <= block_b:
        bm = B8
        B_pad = B8
    else:
        bm = block_b
        B_pad = _round_up(B8, bm)
    nblk_b = B_pad // bm

    x = sample
    if B_pad != B:
        x = jnp.pad(x, ((0, B_pad - B), (0, 0)))
    x = _pad_axis(x, 1, Cin_p)
    if has_cond:
        c = condition
        if B_pad != B:
            c = jnp.pad(c, ((0, B_pad - B), (0, 0)))
        c = _pad_axis(c, 1, Ccond_p)

    # ---- Dout (W2 column) tiling ------------------------------------------
    # Single batch block: stream W2 tiles so their DMA overlaps compute.
    # >= 2 batch blocks: keep W2 resident; batch pipelining hides its DMA and
    # we avoid re-fetching W2 once per batch block.
    if nblk_b >= 2:
        bn = Dout_p
    else:
        bn = _pick_n_tile(Dout_p, block_n)
    nblk_n = Dout_p // bn

    grid = (nblk_b, nblk_n)
    dim_sem = ("parallel", "arbitrary")

    # ---- BlockSpecs ---------------------------------------------------------
    def const_spec(shape):
        # Grid-invariant block: VMEM-resident; single-buffer when supported to
        # halve its footprint (matters most on v7x's 64 MiB VMEM).
        if _HAS_PIPELINE_MODE:
            return pl.BlockSpec(shape, lambda i, j: (0, 0),
                                pipeline_mode=pl.Buffered(1))
        return pl.BlockSpec(shape, lambda i, j: (0, 0))

    if nblk_n == 1:
        w2_spec = const_spec((D_p, bn))
        b2_spec = const_spec((1, bn))
        w2_bufs = 1 if _HAS_PIPELINE_MODE else 2
    else:
        w2_spec = pl.BlockSpec((D_p, bn), lambda i, j: (0, j))
        b2_spec = pl.BlockSpec((1, bn), lambda i, j: (0, j))
        w2_bufs = 2

    samp_spec = pl.BlockSpec((bm, Cin_p), lambda i, j: (i, 0))
    out_spec = pl.BlockSpec((bm, bn), lambda i, j: (i, j))

    # ---- VMEM budget + cost estimate ---------------------------------------
    w_isz = jnp.dtype(w1.dtype).itemsize
    a_isz = jnp.dtype(sample.dtype).itemsize
    res_mult = 1 if _HAS_PIPELINE_MODE else 2
    resident_bytes = (Cin_p * D_p + D_p) * w_isz
    if has_cond:
        resident_bytes += Ccond_p * Cin_p * w_isz
    w2_bytes = w2_bufs * (D_p * bn + bn) * w_isz
    act_bytes = 2 * bm * Cin_p * a_isz + 2 * bm * bn * a_isz
    if has_cond:
        act_bytes += 2 * bm * Ccond_p * a_isz
    h_bytes = bm * D_p * 4  # f32 intermediate scratch
    vmem_need = res_mult * resident_bytes + w2_bytes + act_bytes + h_bytes
    # need + headroom, capped at 48 MiB (leaves slack on v7x's 64 MiB VMEM);
    # no artificial 32 MiB floor when the working set is small.
    vmem_limit = int(min(vmem_need + (8 << 20),
                         max(48 << 20, vmem_need + (2 << 20))))

    flops = 2 * B_pad * (Cin_p * D_p + D_p * Dout_p)
    if has_cond:
        flops += 2 * B_pad * Ccond_p * Cin_p
    transcendentals = B_pad * D_p + (B_pad * Dout_p if post_act else 0)
    bytes_accessed = (resident_bytes + (D_p * Dout_p + Dout_p) * w_isz
                      + B_pad * (Cin_p + Dout_p + Ccond_p) * a_isz)
    cost = pl.CostEstimate(flops=int(flops),
                           transcendentals=int(transcendentals),
                           bytes_accessed=int(bytes_accessed))

    compiler_params = pltpu.CompilerParams(
        dimension_semantics=dim_sem, vmem_limit_bytes=vmem_limit)

    if has_cond:
        kernel = functools.partial(_mlp_cond_kernel, post_act=post_act)
        in_specs = [samp_spec,
                    pl.BlockSpec((bm, Ccond_p), lambda i, j: (i, 0)),
                    const_spec(wc.shape), const_spec(w1.shape),
                    const_spec(b1.shape), w2_spec, b2_spec]
        args = (x, c, wc, w1, b1, w2, b2)
    else:
        kernel = functools.partial(_mlp_kernel, post_act=post_act)
        in_specs = [samp_spec, const_spec(w1.shape), const_spec(b1.shape),
                    w2_spec, b2_spec]
        args = (x, w1, b1, w2, b2)

    out = pl.pallas_call(
        kernel,
        out_shape=jax.ShapeDtypeStruct((B_pad, Dout_p), sample.dtype),
        grid=grid,
        in_specs=in_specs,
        out_specs=out_spec,
        scratch_shapes=[pltpu.VMEM((bm, D_p), jnp.float32)],
        compiler_params=compiler_params,
        cost_estimate=cost,
    )(*args)

    if B_pad != B or Dout_p != Dout:
        out = out[:B, :Dout]
    return out


# --------------------------------------------------------------------------
# Deterministic parameter init (mirrors nn.Linear's U(-1/sqrt(fan_in), +..))
# --------------------------------------------------------------------------
def init_params(key, in_channels, time_embed_dim, out_dim=None,
                cond_proj_dim=None, dtype=jnp.float32):
    out_dim = time_embed_dim if out_dim is None else out_dim
    k1, k2, k3, k4, k5 = jax.random.split(key, 5)

    def uniform(k, shape, fan_in):
        bound = 1.0 / math.sqrt(fan_in)
        return jax.random.uniform(k, shape, dtype, -bound, bound)

    params = {
        # stored pre-transposed: [in, out]
        "w1": uniform(k1, (in_channels, time_embed_dim), in_channels),
        "b1": uniform(k2, (1, time_embed_dim), in_channels),
        "w2": uniform(k3, (time_embed_dim, out_dim), time_embed_dim),
        "b2": uniform(k4, (1, out_dim), time_embed_dim),
    }
    if cond_proj_dim is not None:
        params["wc"] = uniform(k5, (cond_proj_dim, in_channels), cond_proj_dim)
    return params


def reference_forward(sample, params, condition=None, post_act=False):
    x = sample
    if condition is not None:
        x = x + condition @ params["wc"]
    h = x @ params["w1"] + params["b1"]
    h = h * jax.nn.sigmoid(h)
    y = h @ params["w2"] + params["b2"]
    if post_act:
        y = y * jax.nn.sigmoid(y)
    return y


if __name__ == "__main__":
    key = jax.random.PRNGKey(0)
    B, Cin, D, Ccond = 8, 32, 64, 16

    kp, ks, kc = jax.random.split(key, 3)
    params = init_params(kp, in_channels=Cin, time_embed_dim=D,
                         cond_proj_dim=Ccond)
    sample = jax.random.normal(ks, (B, Cin), jnp.float32)
    condition = jax.random.normal(kc, (B, Ccond), jnp.float32)

    prep_f32 = prepare_params(params)  # pad once at "load" time

    # case 1: f32, no condition, no post_act (grid collapses to (1, 1))
    out1 = jax.block_until_ready(
        timestep_embedding_forward(sample, prep_f32, None, post_act=False))
    ref1 = reference_forward(sample, params, None, post_act=False)
    assert out1.shape == (B, D)
    assert jnp.allclose(out1, ref1, atol=1e-5, rtol=1e-5)

    # case 2: f32, with condition (cond_proj branch) + post_act SiLU
    out2 = jax.block_until_ready(
        timestep_embedding_forward(sample, prep_f32, condition, post_act=True))
    ref2 = reference_forward(sample, params, condition, post_act=True)
    assert out2.shape == (B, D)
    assert jnp.allclose(out2, ref2, atol=1e-5, rtol=1e-5)

    # case 3: bf16 weights cast once at prepare time (native bf16 MXU path,
    # f32 accumulation), bf16 activations.
    prep_bf16 = prepare_params(params, weights_dtype=jnp.bfloat16)
    sample_bf = sample.astype(jnp.bfloat16)
    cond_bf = condition.astype(jnp.bfloat16)
    out3 = jax.block_until_ready(
        timestep_embedding_forward(sample_bf, prep_bf16, cond_bf,
                                   post_act=False))
    ref3 = reference_forward(
        sample_bf.astype(jnp.float32),
        {k: v.astype(jnp.bfloat16).astype(jnp.float32)
         for k, v in params.items()},
        cond_bf.astype(jnp.float32), post_act=False)
    assert out3.dtype == jnp.bfloat16 and out3.shape == (B, D)
    assert jnp.allclose(out3.astype(jnp.float32), ref3, atol=1e-1, rtol=1e-1)

    # case 4: wider out_dim + small block_n so W2 is streamed over Dout tiles
    # (grid = (1, 3): W2 tile DMA overlaps compute of the previous tile).
    params4 = init_params(kp, in_channels=Cin, time_embed_dim=D, out_dim=320)
    prep4 = prepare_params(params4)
    out4 = jax.block_until_ready(
        timestep_embedding_forward(sample, prep4, None, post_act=False,
                                   block_n=128))
    ref4 = reference_forward(sample, params4, None, post_act=False)
    assert out4.shape == (B, 320)
    assert jnp.allclose(out4, ref4, atol=1e-5, rtol=1e-5)

    # case 5: B not a multiple of the batch tile (exercises batch padding and
    # the multi-batch-block path with resident W2; grid = (3, 1)).
    B5 = 20
    sample5 = jax.random.normal(jax.random.PRNGKey(1), (B5, Cin), jnp.float32)
    out5 = jax.block_until_ready(
        timestep_embedding_forward(sample5, prep_f32, None, post_act=False,
                                   block_b=8))
    ref5 = reference_forward(sample5, params, None, post_act=False)
    assert out5.shape == (B5, D)
    assert jnp.allclose(out5, ref5, atol=1e-5, rtol=1e-5)

    print("KERNEL_OK")
</pallas_src>

<mosaic_0001>
module attributes {stable_mosaic.version = 11 : i64} {
  func.func @_mlp_kernel(%arg0: i32, %arg1: i32, %arg2: memref<8x128xf32, #tpu.memory_space<vmem>>, %arg3: memref<128x128xf32, #tpu.memory_space<vmem>>, %arg4: memref<1x128xf32, #tpu.memory_space<vmem>>, %arg5: memref<128x128xf32, #tpu.memory_space<vmem>>, %arg6: memref<1x128xf32, #tpu.memory_space<vmem>>, %arg7: memref<8x128xf32, #tpu.memory_space<vmem>>, %arg8: memref<8x128xf32, #tpu.memory_space<vmem>>) attributes {dimension_semantics = [#tpu.dimension_semantics<parallel>, #tpu.dimension_semantics<arbitrary>], iteration_bounds = array<i64: 1, 1>, scalar_prefetch = 0 : i64, scratch_operands = 1 : i64, tpu.core_type = #tpu.core_type<tc>, window_params = [{transform_indices = @transform_0, window_bounds = array<i64: 8, 128>}, {pipeline_mode = #tpu.pipeline_mode<synchronous>, transform_indices = @transform_1, window_bounds = array<i64: 128, 128>}, {pipeline_mode = #tpu.pipeline_mode<synchronous>, transform_indices = @transform_2, window_bounds = array<i64: 1, 128>}, {pipeline_mode = #tpu.pipeline_mode<synchronous>, transform_indices = @transform_3, window_bounds = array<i64: 128, 128>}, {pipeline_mode = #tpu.pipeline_mode<synchronous>, transform_indices = @transform_4, window_bounds = array<i64: 1, 128>}, {transform_indices = @transform_5, window_bounds = array<i64: 8, 128>}]} {
    %c0_i32 = arith.constant 0 : i32
    %0 = arith.cmpi eq, %arg1, %c0_i32 : i32
    %1 = arith.extui %0 : i1 to i32
    %c0_i32_0 = arith.constant 0 : i32
    %2 = arith.cmpi ne, %1, %c0_i32_0 : i32
    scf.if %2 {
      %c0_8 = arith.constant 0 : index
      %c0_9 = arith.constant 0 : index
      %10 = vector.load %arg2[%c0_8, %c0_9] : memref<8x128xf32, #tpu.memory_space<vmem>>, vector<8x128xf32>
      %c0_10 = arith.constant 0 : index
      %c0_11 = arith.constant 0 : index
      %11 = vector.load %arg3[%c0_10, %c0_11] : memref<128x128xf32, #tpu.memory_space<vmem>>, vector<128x128xf32>
      %cst_12 = arith.constant dense<0.000000e+00> : vector<8x128xf32>
      %12 = tpu.matmul %10, %11, %cst_12 {dimension_numbers = #tpu.dot_dimension_numbers<[1], [0], [0], [1], [0, 0, 1, 1], [], []>} : vector<8x128xf32>, vector<128x128xf32>, vector<8x128xf32> -> vector<8x128xf32>
      %c0_13 = arith.constant 0 : index
      %c0_14 = arith.constant 0 : index
      %13 = vector.load %arg4[%c0_13, %c0_14] : memref<1x128xf32, #tpu.memory_space<vmem>>, vector<1x128xf32>
      %14 = vector.broadcast %13 : vector<1x128xf32> to vector<8x128xf32>
      %15 = arith.addf %12, %14 : vector<8x128xf32>
      %16 = arith.negf %15 : vector<8x128xf32>
      %17 = math.exp %16 : vector<8x128xf32>
      %cst_15 = arith.constant 1.000000e+00 : f32
      %18 = vector.broadcast %cst_15 : f32 to vector<8x128xf32>
      %19 = arith.addf %18, %17 : vector<8x128xf32>
      %20 = arith.divf %18, %19 : vector<8x128xf32>
      %21 = arith.mulf %15, %20 : vector<8x128xf32>
      %c0_16 = arith.constant 0 : index
      %c0_17 = arith.constant 0 : index
      %22 = vector.load %arg8[%c0_16, %c0_17] : memref<8x128xf32, #tpu.memory_space<vmem>>, vector<8x128xf32>
      tpu.vector_store %arg8[%c0_16, %c0_17], %21 {strides = array<i32>} : memref<8x128xf32, #tpu.memory_space<vmem>>, vector<8x128xf32>,
    } else {
    }
    %c0 = arith.constant 0 : index
    %c0_1 = arith.constant 0 : index
    %3 = vector.load %arg8[%c0, %c0_1] : memref<8x128xf32, #tpu.memory_space<vmem>>, vector<8x128xf32>
    %c0_2 = arith.constant 0 : index
    %c0_3 = arith.constant 0 : index
    %4 = vector.load %arg5[%c0_2, %c0_3] : memref<128x128xf32, #tpu.memory_space<vmem>>, vector<128x128xf32>
    %cst = arith.constant dense<0.000000e+00> : vector<8x128xf32>
    %5 = tpu.matmul %3, %4, %cst {dimension_numbers = #tpu.dot_dimension_numbers<[1], [0], [0], [1], [0, 0, 1, 1], [], []>} : vector<8x128xf32>, vector<128x128xf32>, vector<8x128xf32> -> vector<8x128xf32>
    %c0_4 = arith.constant 0 : index
    %c0_5 = arith.constant 0 : index
    %6 = vector.load %arg6[%c0_4, %c0_5] : memref<1x128xf32, #tpu.memory_space<vmem>>, vector<1x128xf32>
    %7 = vector.broadcast %6 : vector<1x128xf32> to vector<8x128xf32>
    %8 = arith.addf %5, %7 : vector<8x128xf32>
    %c0_6 = arith.constant 0 : index
    %c0_7 = arith.constant 0 : index
    %9 = vector.load %arg7[%c0_6, %c0_7] : memref<8x128xf32, #tpu.memory_space<vmem>>, vector<8x128xf32>
    tpu.vector_store %arg7[%c0_6, %c0_7], %8 {strides = array<i32>} : memref<8x128xf32, #tpu.memory_space<vmem>>, vector<8x128xf32>,
    return
  }
  func.func @transform_0(%arg0: i32, %arg1: i32) -> (i32, i32) {
    %c0_i32 = arith.constant 0 : i32
    %c0_i32_0 = arith.constant 0 : i32
    return %arg0, %c0_i32 : i32, i32
  }
  func.func @transform_1(%arg0: i32, %arg1: i32) -> (i32, i32) {
    %c0_i32 = arith.constant 0 : i32
    %c0_i32_0 = arith.constant 0 : i32
    %c0_i32_1 = arith.constant 0 : i32
    return %c0_i32, %c0_i32_0 : i32, i32
  }
  func.func @transform_2(%arg0: i32, %arg1: i32) -> (i32, i32) {
    %c0_i32 = arith.constant 0 : i32
    %c0_i32_0 = arith.constant 0 : i32
    %c0_i32_1 = arith.constant 0 : i32
    return %c0_i32, %c0_i32_0 : i32, i32
  }
  func.func @transform_3(%arg0: i32, %arg1: i32) -> (i32, i32) {
    %c0_i32 = arith.constant 0 : i32
    %c0_i32_0 = arith.constant 0 : i32
    %c0_i32_1 = arith.constant 0 : i32
    return %c0_i32, %c0_i32_0 : i32, i32
  }
  func.func @transform_4(%arg0: i32, %arg1: i32) -> (i32, i32) {
    %c0_i32 = arith.constant 0 : i32
    %c0_i32_0 = arith.constant 0 : i32
    %c0_i32_1 = arith.constant 0 : i32
    return %c0_i32, %c0_i32_0 : i32, i32
  }
  func.func @transform_5(%arg0: i32, %arg1: i32) -> (i32, i32) {
    %c0_i32 = arith.constant 0 : i32
    return %arg0, %arg1 : i32, i32
  }
}

</mosaic_0001>

<bundles_post_ra>
// kernel: tpu_custom_call.1
= control target key start
LH: loop header
LB: loop body
LE: loop exit
PB: predicated region body
PF: predicated region fallthrough
CT: control target
= control target key end

     0   :  { %10 = vsyncpa [#allocation4], 0  ;;  %s654_s0 = inlined_call_operand.hbm [shape: f32[8,128], index: 0, kind: input, shape index: {}]   ;;  %s655_s1 = inlined_call_operand.hbm [shape: f32[128,128], index: 1, kind: input, shape index: {}]   ;;  %s656_s2 = inlined_call_operand.vmem [shape: f32[1,128], index: 2, kind: input, shape index: {}]   ;;  %s657_s3 = inlined_call_operand.hbm [shape: f32[128,128], index: 3, kind: input, shape index: {}]   ;;  %s658_s4 = inlined_call_operand.vmem [shape: f32[1,128], index: 4, kind: input, shape index: {}]   ;;  %s659_s5 = inlined_call_operand.hbm [shape: f32[8,128], index: 5, kind: output, shape index: {}]  }
   0x1   :  { %11 = vsyncpa [#allocation7], 0 }
   0x2   :  { %12 = vsyncpa [#allocation5], 0  ;;  %s539_s18 = smov [#allocation6]   ;;  %s445_s22 = scalar_lea.hbm %s655_s1, 2048 }
   0x3   :  { %s28_s19 = sshll.u32 %s539_s18, 4  ;;  %p446_p0 = scmp.ne.s32.totalorder %s655_s1, %s445_s22  ;;  %s29_s19 = int_to_ptr.vmem [resolvable:$true] %s28_s19 }
   0x4   :  { %p449_p1 = scmp.lt.u32.totalorder %s445_s22, %s655_s1 }
   0x6   :  { %p451_p2 = pnand %p449_p1, %p446_p0 }
   0x8   :  { %454 = shalt.err (!%p451_p2)
}
   0x9   :  { %s455_s27 = scalar_lea.vmem %s29_s19, 2048  ;;  %p460_p4 = scmp.lt.s32.totalorder %s29_s19, %s29_s19 }
   0xa   :  { %p456_p3 = scmp.ne.s32.totalorder %s29_s19, %s455_s27  ;;  %p461_p5 = scmp.lt.s32.totalorder %s455_s27, %s455_s27 }
   0xc   :  { %p462_p6 = por %p461_p5, %p460_p4 }
   0xe   :  { %p463_p7 = pnand %p462_p6, %p456_p3 }
  0x10   :  { %466 = shalt.err (!%p463_p7)
}
  0x11   :  { %s540_s28 = smov 128   ;;  %s541_s29 = smov 8  }
  0x12   :  { %34 = dma.hbm_to_vmem [thread:$0]  %s655_s1, 2048, %s29_s19, [#allocation7], %s540_s28, %s540_s28, %s541_s29  }
  0x13   :  { %s542_s7 = smov [#allocation3]   ;;  %s543_s9 = smov [#allocation8]  }
  0x14   :  { %s19_s8 = sshll.u32 %s542_s7, 4  ;;  %s42_s10 = sshll.u32 %s543_s9, 4  ;;  %s20_s8 = int_to_ptr.vmem [resolvable:$true] %s19_s8  ;;  %s43_s10 = int_to_ptr.vmem [resolvable:$true] %s42_s10 }
  0x15   :  { %s467_s13 = scalar_lea.hbm %s654_s0, 128 }
  0x16   :  { %p468_p8 = scmp.ne.s32.totalorder %s654_s0, %s467_s13  ;;  %p471_p9 = scmp.lt.u32.totalorder %s467_s13, %s654_s0 }
  0x18   :  { %p473_p10 = pnand %p471_p9, %p468_p8 }
  0x1a   :  { %476 = shalt.err (!%p473_p10)
}
  0x1b   :  { %s477_s1 = scalar_lea.vmem %s20_s8, 128  ;;  %p482_p12 = scmp.lt.s32.totalorder %s20_s8, %s20_s8 }
  0x1c   :  { %p478_p11 = scmp.ne.s32.totalorder %s20_s8, %s477_s1  ;;  %p483_p13 = scmp.lt.s32.totalorder %s477_s1, %s477_s1 }
  0x1e   :  { %p484_p0 = por %p483_p13, %p482_p12 }
  0x20   :  { %p485_p1 = pnand %p484_p0, %p478_p11 }
  0x22   :  { %488 = shalt.err (!%p485_p1)
}
  0x23   :  { %22 = dma.hbm_to_vmem [thread:$0]  %s654_s0, 128, %s20_s8, [#allocation4]  }
  0x24   :  { %s489_s22 = scalar_lea.hbm %s657_s3, 2048 }
  0x25   :  { %p490_p2 = scmp.ne.s32.totalorder %s657_s3, %s489_s22  ;;  %p493_p3 = scmp.lt.u32.totalorder %s489_s22, %s657_s3 }
  0x27   :  { %p495_p4 = pnand %p493_p3, %p490_p2 }
  0x29   :  { %498 = shalt.err (!%p495_p4)
}
  0x2a   :  { %s499_s27 = scalar_lea.vmem %s43_s10, 2048  ;;  %p504_p6 = scmp.lt.s32.totalorder %s43_s10, %s43_s10 }
  0x2b   :  { %p500_p5 = scmp.ne.s32.totalorder %s43_s10, %s499_s27  ;;  %p505_p7 = scmp.lt.s32.totalorder %s499_s27, %s499_s27 }
  0x2d   :  { %p506_p8 = por %p505_p7, %p504_p6 }
  0x2f   :  { %p507_p9 = pnand %p506_p8, %p500_p5 }
  0x31   :  { %510 = shalt.err (!%p507_p9)
}
  0x32   :  { %48 = dma.hbm_to_vmem [thread:$0]  %s657_s3, 2048, %s43_s10, [#allocation7], %s540_s28, %s540_s28, %s541_s29  }
  0x33   :  { %533 = dma.done.wait [#allocation4], 128  }
  0x34   :  { %534 = vsyncadd [#allocation4], 4294967168 }
  0x35   :  { %535 = dma.done.wait [#allocation7], 4096  }
  0x36   :  { %536 = vsyncadd [#allocation7], 4294963200  ;;  %v544_v0 = vmov 0.0|0.0   ;;  %vm545_vm0 = vmmov 0   ;;  %v546_v1 = vmov 0.0   ;;  %v65_v2 = vld [vmem:[#allocation6] sm:$0xff] }
  0x37   :  { %384 = vmatprep.subr.bf16.mxu0 %v544_v0  ;;  %346 = vmatprep.mubr.msk.f32.mxu0 %vm545_vm0, %v546_v1  ;;  %v66_v3 = vld [vmem:[#allocation6 + $0x8] sm:$0xff]  ;;  %v67_v4 = vld [vmem:[#allocation6 + $0x10] sm:$0xff]  ;;  %v68_v6 = vld [vmem:[#allocation6 + $0x18] sm:$0xff]  ;;  %s547_s7 = smov [#allocation9]  }
  0x38   :  { %408 = vmatprep.subr.bf16.mxu1 %v544_v0  ;;  %381 = vmatprep.mubr.msk.f32.mxu1 %vm545_vm0, %v546_v1  ;;  %v385_v5 = vpack.c.bf16 %v66_v3, %v65_v2  ;;  %v388_v7 = vpack.c.bf16 %v68_v6, %v67_v4  ;;  %v69_v8 = vld [vmem:[#allocation6 + $0x20] sm:$0xff]  ;;  %v70_v9 = vld [vmem:[#allocation6 + $0x28] sm:$0xff]  ;;  %v71_v11 = vld [vmem:[#allocation6 + $0x30] sm:$0xff]  ;;  %s267_s8 = sshll.u32 %s547_s7, 4  ;;  %s268_s8 = int_to_ptr.vmem [resolvable:$true] %s267_s8 }
  0x39   :  { %v391_v10 = vpack.c.bf16 %v70_v9, %v69_v8  ;;  %v72_v12 = vld [vmem:[#allocation6 + $0x38] sm:$0xff]  ;;  %v73_v14 = vld [vmem:[#allocation6 + $0x40] sm:$0xff]  ;;  %v74_v15 = vld [vmem:[#allocation6 + $0x48] sm:$0xff]  ;;  %p516_p11 = scmp.lt.s32.totalorder %s268_s8, %s268_s8 }
  0x3a   :  { %386 = vmatpush3.bf16.msra.mxu0 %v385_v5  ;;  %v394_v13 = vpack.c.bf16 %v72_v12, %v71_v11  ;;  %v397_v16 = vpack.c.bf16 %v74_v15, %v73_v14  ;;  %v75_v17 = vld [vmem:[#allocation6 + $0x50] sm:$0xff]  ;;  %v76_v18 = vld [vmem:[#allocation6 + $0x58] sm:$0xff]  ;;  %v77_v20 = vld [vmem:[#allocation6 + $0x60] sm:$0xff] }
  0x3b   :  { %387 = vmatprep.subr.bf16.mxu0 %v544_v0  ;;  %v400_v19 = vpack.c.bf16 %v76_v18, %v75_v17  ;;  %v78_v21 = vld [vmem:[#allocation6 + $0x68] sm:$0xff]  ;;  %v79_v23 = vld [vmem:[#allocation6 + $0x70] sm:$0xff]  ;;  %v80_v24 = vld [vmem:[#allocation6 + $0x78] sm:$0xff] }
  0x3c   :  { %v403_v22 = vpack.c.bf16 %v78_v21, %v77_v20  ;;  %v406_v25 = vpack.c.bf16 %v80_v24, %v79_v23  ;;  %v64_v26 = vld [vmem:[#allocation3] sm:$0xff]  ;;  %v167_v27 = vld [vmem:[#allocation8] sm:$0xff]  ;;  %v168_v28 = vld [vmem:[#allocation8 + $0x8] sm:$0xff] }
  0x3d   :  { %v409_v29 = vpack.c.bf16 %v168_v28, %v167_v27  ;;  %v169_v30 = vld [vmem:[#allocation8 + $0x10] sm:$0xff]  ;;  %v170_v31 = vld [vmem:[#allocation8 + $0x18] sm:$0xff]  ;;  %v171_v33 = vld [vmem:[#allocation8 + $0x20] sm:$0xff] }
  0x3e   :  { %389 = vmatpush3.bf16.msra.mxu0 %v388_v7  ;;  %v412_v32 = vpack.c.bf16 %v170_v31, %v169_v30  ;;  %v172_v34 = vld [vmem:[#allocation8 + $0x28] sm:$0xff]  ;;  %v173_v36 = vld [vmem:[#allocation8 + $0x30] sm:$0xff]  ;;  %v174_v37 = vld [vmem:[#allocation8 + $0x38] sm:$0xff] }
  0x3f   :  { %390 = vmatprep.subr.bf16.mxu0 %v544_v0  ;;  %410 = vmatpush3.bf16.msra.mxu1 %v409_v29  ;;  %v415_v35 = vpack.c.bf16 %v172_v34, %v171_v33  ;;  %v418_v38 = vpack.c.bf16 %v174_v37, %v173_v36  ;;  %v175_v39 = vld [vmem:[#allocation8 + $0x40] sm:$0xff]  ;;  %v176_v40 = vld [vmem:[#allocation8 + $0x48] sm:$0xff]  ;;  %v177_v42 = vld [vmem:[#allocation8 + $0x50] sm:$0xff] }
  0x40   :  { %411 = vmatprep.subr.bf16.mxu1 %v544_v0  ;;  %v421_v41 = vpack.c.bf16 %v176_v40, %v175_v39  ;;  %v178_v43 = vld [vmem:[#allocation8 + $0x58] sm:$0xff]  ;;  %v179_v45 = vld [vmem:[#allocation8 + $0x60] sm:$0xff]  ;;  %v180_v46 = vld [vmem:[#allocation8 + $0x68] sm:$0xff] }
  0x41   :  { %v424_v44 = vpack.c.bf16 %v178_v43, %v177_v42  ;;  %v427_v47 = vpack.c.bf16 %v180_v46, %v179_v45  ;;  %v181_v48 = vld [vmem:[#allocation8 + $0x70] sm:$0xff]  ;;  %v182_v49 = vld [vmem:[#allocation8 + $0x78] sm:$0xff] }
  0x42   :  { %392 = vmatpush3.bf16.msra.mxu0 %v391_v10  ;;  %v430_v50 = vpack.c.bf16 %v182_v49, %v181_v48  ;;  %v277_v51 = vld [vmem:[%s656_s2] ss:$0 sm:$0xff]  ;;  %s511_s2 = scalar_lea.vmem %s268_s8, 128 }
  0x43   :  { %393 = vmatprep.subr.bf16.mxu0 %v544_v0  ;;  %413 = vmatpush3.bf16.msra.mxu1 %v412_v32  ;;  %v279_v60 = vld [vmem:[%s658_s4] ss:$0 sm:$0xff]  ;;  %p512_p10 = scmp.ne.s32.totalorder %s268_s8, %s511_s2  ;;  %p517_p12 = scmp.lt.s32.totalorder %s511_s2, %s511_s2 }
  0x44   :  { %414 = vmatprep.subr.bf16.mxu1 %v544_v0 }
  0x45   :  { %p518_p13 = por %p517_p12, %p516_p11 }
  0x46   :  { %395 = vmatpush3.bf16.msra.mxu0 %v394_v13 }
  0x47   :  { %396 = vmatprep.subr.bf16.mxu0 %v544_v0  ;;  %416 = vmatpush3.bf16.msra.mxu1 %v415_v35  ;;  %p519_p0 = pnand %p518_p13, %p512_p10 }
  0x48   :  { %417 = vmatprep.subr.bf16.mxu1 %v544_v0 }
  0x4a   :  { %398 = vmatpush3.bf16.msra.mxu0 %v397_v16 }
  0x4b   :  { %399 = vmatprep.subr.bf16.mxu0 %v544_v0  ;;  %419 = vmatpush3.bf16.msra.mxu1 %v418_v38 }
  0x4c   :  { %420 = vmatprep.subr.bf16.mxu1 %v544_v0 }
  0x4e   :  { %401 = vmatpush3.bf16.msra.mxu0 %v400_v19 }
  0x4f   :  { %402 = vmatprep.subr.bf16.mxu0 %v544_v0  ;;  %422 = vmatpush3.bf16.msra.mxu1 %v421_v41 }
  0x50   :  { %423 = vmatprep.subr.bf16.mxu1 %v544_v0 }
  0x52   :  { %404 = vmatpush3.bf16.msra.mxu0 %v403_v22 }
  0x53   :  { %405 = vmatprep.subr.bf16.mxu0 %v544_v0  ;;  %425 = vmatpush3.bf16.msra.mxu1 %v424_v44 }
  0x54   :  { %426 = vmatprep.subr.bf16.mxu1 %v544_v0 }
  0x56   :  { %407 = vmatpush3.bf16.msra.mxu0 %v406_v25 }
  0x57   :  { %428 = vmatpush3.bf16.msra.mxu1 %v427_v47 }
  0x58   :  { %429 = vmatprep.subr.bf16.mxu1 %v544_v0 }
  0x59   :  { %347 = vmatmul.mubr.f32.vlgmr.msra.gmra.mrb[0].mxu0 %v64_v26 }
  0x5b   :  { %431 = vmatpush3.bf16.msra.mxu1 %v430_v50 }
 0x12c   :  { %v154_v52 = vpop.f32.mrb[0].mxu0 }
 0x12d   :  { %v155_v53 = vadd.f32 %v277_v51, %v154_v52  ;;  %v348_v54 = vpop.f32.mrb[1].mxu0 }
 0x12f   :  { %v278_v55 = vmul.f32 -1.442695, %v155_v53 }
 0x131   :  { %441 = vpow2.f32 %v278_v55 }
 0x13b   :  { %v442_v56 = vpop.eup %441 }
 0x13c   :  { %v161_v57 = vadd.f32 1.0, %v442_v56 }
 0x13e   :  { %443 = vrcp.f32 %v161_v57 }
 0x148   :  { %v444_v58 = vpop.eup %443 }
 0x149   :  { %v164_v59 = vmul.f32 %v444_v58, %v155_v53 }
 0x14b   :  { %382 = vmatmul.mubr.f32.vlgmr.msra.gmra.mrb[0].mxu1 %v164_v59 }
 0x21e   :  { %v256_v61 = vpop.f32.mrb[0].mxu1 }
 0x21f   :  { %v257_v62 = vadd.f32 %v279_v60, %v256_v61  ;;  %v383_v63 = vpop.f32.mrb[1].mxu1 }
 0x221   :  { %260 = vst [vmem:[#allocation9] sm:$0xff] %v257_v62 }
 0x222   :  { %522 = shalt.err (!%p519_p0)
}
 0x223   :  { %s523_s11 = scalar_lea.hbm %s659_s5, 128 }
 0x224   :  { %p524_p1 = scmp.ne.s32.totalorder %s659_s5, %s523_s11  ;;  %p527_p2 = scmp.lt.u32.totalorder %s523_s11, %s659_s5 }
 0x226   :  { %p529_p3 = pnand %p527_p2, %p524_p1 }
 0x228   :  { %532 = shalt.err (!%p529_p3)
}
 0x229   :  { %270 = dma.vmem_to_hbm [thread:$0]  %s268_s8, 128, %s659_s5, [#allocation5]  }
 0x22a   :  { %537 = dma.done.wait [#allocation5], 128  }
 0x22b   :  { %538 = vsyncadd [#allocation5], 4294967168 }
 0x22c   :  { %274 = vsyncpa [#allocation4], 1 }
 0x22d   :  { %275 = vsyncpa [#allocation7], 1 }
 0x22e   :  { %276 = vsyncpa [#allocation5], 1 }

</bundles_post_ra>
